<compile_context>
chip_gen: v7x
topology: tpu7x:2x2x1
jax: 0.10.0
libtpu: 0.0.40
codegen_flags: <defaults>
</compile_context>

<pallas_src>
import functools
import math

import jax
import jax.numpy as jnp
from jax.experimental import pallas as pl
from jax.experimental.pallas import tpu as pltpu


def _attention_head_kernel(*refs, batch_block: int, seq_len: int,
                           shared_input: bool, is_causal: bool):
    """One grid step = `batch_block` batch elements (the whole batch here)."""
    if shared_input:
        x_ref, w_ref, b_ref, o_ref = refs
        x = x_ref[...]                      # (bb*S, D), loaded from VMEM once
        q_in = k_in = v_in = x
    else:
        q_ref, k_ref, v_ref, w_ref, b_ref, o_ref = refs
        q_in, k_in, v_in = q_ref[...], k_ref[...], v_ref[...]

    bb, S = batch_block, seq_len
    H = w_ref.shape[-1]
    cdt = q_in.dtype                        # MXU compute dtype (bf16)

    # Projections: plain x @ W (weights pre-transposed host-side; 1/sqrt(d_k)
    # already folded into W_q / b_q), f32 accumulation, f32 bias add.
    q = jnp.dot(q_in, w_ref[0], preferred_element_type=jnp.float32) + b_ref[0]
    k = jnp.dot(k_in, w_ref[1], preferred_element_type=jnp.float32) + b_ref[1]
    v = jnp.dot(v_in, w_ref[2], preferred_element_type=jnp.float32) + b_ref[2]

    # Restore per-batch structure (leading-dim split only; minor dim unchanged).
    q = q.reshape(bb, S, H).astype(cdt)
    k = k.reshape(bb, S, H).astype(cdt)
    v = v.reshape(bb, S, H).astype(cdt)

    # scores = (x Wq / sqrt(d_k)) @ (x Wk)^T — contraction on the last axes of
    # both operands, so no transposed K tile is ever materialized.
    scores = jnp.einsum('bqh,bkh->bqk', q, k,
                        preferred_element_type=jnp.float32)

    if is_causal:
        # Lower-triangular keep-mask (query index >= key index).
        row = jax.lax.broadcasted_iota(jnp.int32, (S, S), 0)
        col = jax.lax.broadcasted_iota(jnp.int32, (S, S), 1)
        keep = (col <= row)[None, :, :]
        scores = jnp.where(keep, scores, -1e30)

    # Numerically-stable softmax in f32; reciprocal goes to the EUP slot.
    scores = scores - jnp.max(scores, axis=-1, keepdims=True)
    p = jnp.exp(scores)
    p = p * pl.reciprocal(jnp.sum(p, axis=-1, keepdims=True), approx=True)

    out = jnp.einsum('bqk,bkh->bqh', p.astype(cdt), v,
                     preferred_element_type=jnp.float32)
    o_ref[...] = out.astype(o_ref.dtype)


def attention_head(querys, keys, values, params, *, is_causal=False,
                   compute_dtype=jnp.bfloat16, batch_block=None):
    """Pallas wrapper. querys/keys/values: (B, S, embed_dim) float32."""
    B, S, D = querys.shape
    wq, bq, wk, bk, wv, bv = params
    H = wq.shape[0]                          # head_dim

    if batch_block is None:
        batch_block = B                      # tiny shapes: whole batch per step
    assert B % batch_block == 0
    nb = B // batch_block

    # Fold the 1/sqrt(d_k) attention scale into the Q projection constants and
    # pre-transpose all weights to (D, H); stack Q/K/V so they arrive as one
    # DMA'd block (loaded exactly once for the whole kernel).
    scale = 1.0 / math.sqrt(H)
    w_stack = jnp.stack([wq.T * scale, wk.T, wv.T], axis=0).astype(compute_dtype)  # (3, D, H)
    b_stack = jnp.stack([bq * scale, bk, bv], axis=0).reshape(3, 1, H)
    b_stack = b_stack.astype(jnp.float32)                                          # bias add stays f32

    shared_input = (querys is keys) and (keys is values)

    # Flatten (B, S, D) -> (B*S, D) host-side (free) so each projection is one
    # larger GEMM; cast MXU inputs to bf16 (halves HBM/VMEM input traffic).
    def prep(x):
        return x.reshape(B * S, D).astype(compute_dtype)

    row_spec = pl.BlockSpec((batch_block * S, D), lambda i: (i, 0))
    w_spec = pl.BlockSpec((3, D, H), lambda i: (0, 0, 0))
    b_spec = pl.BlockSpec((3, 1, H), lambda i: (0, 0, 0))
    out_spec = pl.BlockSpec((batch_block, S, H), lambda i: (i, 0, 0))

    kernel = functools.partial(_attention_head_kernel,
                               batch_block=batch_block, seq_len=S,
                               shared_input=shared_input, is_causal=is_causal)

    if shared_input:
        inputs = (prep(querys), w_stack, b_stack)
        in_specs = [row_spec, w_spec, b_spec]
    else:
        inputs = (prep(querys), prep(keys), prep(values), w_stack, b_stack)
        in_specs = [row_spec, row_spec, row_spec, w_spec, b_spec]

    return pl.pallas_call(
        kernel,
        out_shape=jax.ShapeDtypeStruct((B, S, H), querys.dtype),
        grid_spec=pltpu.PrefetchScalarGridSpec(
            num_scalar_prefetch=0,
            grid=(nb,),
            in_specs=in_specs,
            out_specs=out_spec,
        ),
        compiler_params=pltpu.CompilerParams(
            dimension_semantics=("parallel",)),
    )(*inputs)


def init_params(key, embed_dim, head_dim):
    """Deterministic nn.Linear-style init: U(-1/sqrt(fan_in), 1/sqrt(fan_in))."""
    ks = jax.random.split(key, 6)
    bound = 1.0 / math.sqrt(embed_dim)
    u = lambda k, shape: jax.random.uniform(k, shape, jnp.float32, -bound, bound)
    wq = u(ks[0], (head_dim, embed_dim)); bq = u(ks[1], (head_dim,))
    wk = u(ks[2], (head_dim, embed_dim)); bk = u(ks[3], (head_dim,))
    wv = u(ks[4], (head_dim, embed_dim)); bv = u(ks[5], (head_dim,))
    return wq, bq, wk, bk, wv, bv


def reference_attention_head(querys, keys, values, params, is_causal=False):
    """Pure-JAX f32 reference mirroring the PyTorch forward."""
    wq, bq, wk, bk, wv, bv = params
    q = querys @ wq.T + bq
    k = keys @ wk.T + bk
    v = values @ wv.T + bv
    dim_k = q.shape[-1]
    scores = (q @ jnp.swapaxes(k, -2, -1)) / math.sqrt(dim_k)
    if is_causal:
        S_q, S_k = q.shape[-2], k.shape[-2]
        mask = jnp.tril(jnp.ones((S_q, S_k), dtype=bool))
        scores = jnp.where(mask, scores, -jnp.inf)
    weights = jax.nn.softmax(scores, axis=-1)
    return weights @ v


if __name__ == "__main__":
    # Shapes consistent with the module: embedding_dim=16, head_dim=16,
    # small batch/sequence (original script uses B=1, S=5; we use B=2, S=8).
    B, S, embed_dim, head_dim = 2, 8, 16, 16

    key = jax.random.PRNGKey(0)
    k_in, k_params, k_perturb = jax.random.split(key, 3)

    x = jax.random.normal(k_in, (B, S, embed_dim), dtype=jnp.float32)
    params = init_params(k_params, embed_dim, head_dim)

    # bf16 MXU inputs + approx reciprocal -> slightly relaxed tolerance vs f32.
    TOL = dict(atol=2e-2, rtol=2e-2)

    # 1) Self-attention call pattern of the original script (q is k is v):
    out = attention_head(x, x, x, params)
    out = jax.block_until_ready(out)
    ref = reference_attention_head(x, x, x, params)
    assert out.shape == (B, S, head_dim)
    assert jnp.allclose(out, ref, **TOL), "mismatch vs reference (shared input)"

    # 2) General path with distinct query/key/value tensors:
    kv = x + 0.1 * jax.random.normal(k_perturb, x.shape, dtype=jnp.float32)
    out2 = attention_head(x, kv, kv, params)
    out2 = jax.block_until_ready(out2)
    ref2 = reference_attention_head(x, kv, kv, params)
    assert out2.shape == (B, S, head_dim)
    assert jnp.allclose(out2, ref2, **TOL), "mismatch vs reference (distinct inputs)"

    # 3) is_causal=True branch of compute_attention:
    out3 = attention_head(x, x, x, params, is_causal=True)
    out3 = jax.block_until_ready(out3)
    ref3 = reference_attention_head(x, x, x, params, is_causal=True)
    assert out3.shape == (B, S, head_dim)
    assert jnp.allclose(out3, ref3, **TOL), "mismatch vs reference (causal)"

    print("KERNEL_OK")
</pallas_src>

<mosaic_0001>
module attributes {stable_mosaic.version = 11 : i64} {
  func.func @_attention_head_kernel(%arg0: i32, %arg1: memref<16x16xbf16, #tpu.memory_space<vmem>>, %arg2: memref<3x16x16xbf16, #tpu.memory_space<vmem>>, %arg3: memref<3x1x16xf32, #tpu.memory_space<vmem>>, %arg4: memref<2x8x16xf32, #tpu.memory_space<vmem>>) attributes {dimension_semantics = [#tpu.dimension_semantics<parallel>], iteration_bounds = array<i64: 1>, scalar_prefetch = 0 : i64, scratch_operands = 0 : i64, tpu.core_type = #tpu.core_type<tc>, window_params = [{transform_indices = @transform_0, window_bounds = array<i64: 16, 16>}, {pipeline_mode = #tpu.pipeline_mode<synchronous>, transform_indices = @transform_1, window_bounds = array<i64: 3, 16, 16>}, {pipeline_mode = #tpu.pipeline_mode<synchronous>, transform_indices = @transform_2, window_bounds = array<i64: 3, 1, 16>}, {transform_indices = @transform_3, window_bounds = array<i64: 2, 8, 16>}]} {
    %c0 = arith.constant 0 : index
    %c0_0 = arith.constant 0 : index
    %0 = vector.load %arg1[%c0, %c0_0] : memref<16x16xbf16, #tpu.memory_space<vmem>>, vector<16x16xbf16>
    %c0_1 = arith.constant 0 : index
    %c0_2 = arith.constant 0 : index
    %c0_3 = arith.constant 0 : index
    %1 = vector.load %arg2[%c0_1, %c0_2, %c0_3] : memref<3x16x16xbf16, #tpu.memory_space<vmem>>, vector<1x16x16xbf16>
    %2 = vector.shape_cast %1 : vector<1x16x16xbf16> to vector<16x16xbf16>
    %cst = arith.constant dense<0.000000e+00> : vector<16x16xf32>
    %3 = tpu.matmul %0, %2, %cst {dimension_numbers = #tpu.dot_dimension_numbers<[1], [0], [0], [1], [0, 0, 1, 1], [], []>} : vector<16x16xbf16>, vector<16x16xbf16>, vector<16x16xf32> -> vector<16x16xf32>
    %c0_4 = arith.constant 0 : index
    %c0_5 = arith.constant 0 : index
    %c0_6 = arith.constant 0 : index
    %4 = vector.load %arg3[%c0_4, %c0_5, %c0_6] : memref<3x1x16xf32, #tpu.memory_space<vmem>>, vector<1x1x16xf32>
    %5 = vector.shape_cast %4 : vector<1x1x16xf32> to vector<1x16xf32>
    %6 = vector.broadcast %5 : vector<1x16xf32> to vector<16x16xf32>
    %7 = arith.addf %3, %6 : vector<16x16xf32>
    %c1 = arith.constant 1 : index
    %c0_7 = arith.constant 0 : index
    %c0_8 = arith.constant 0 : index
    %8 = vector.load %arg2[%c1, %c0_7, %c0_8] : memref<3x16x16xbf16, #tpu.memory_space<vmem>>, vector<1x16x16xbf16>
    %9 = vector.shape_cast %8 : vector<1x16x16xbf16> to vector<16x16xbf16>
    %cst_9 = arith.constant dense<0.000000e+00> : vector<16x16xf32>
    %10 = tpu.matmul %0, %9, %cst_9 {dimension_numbers = #tpu.dot_dimension_numbers<[1], [0], [0], [1], [0, 0, 1, 1], [], []>} : vector<16x16xbf16>, vector<16x16xbf16>, vector<16x16xf32> -> vector<16x16xf32>
    %c1_10 = arith.constant 1 : index
    %c0_11 = arith.constant 0 : index
    %c0_12 = arith.constant 0 : index
    %11 = vector.load %arg3[%c1_10, %c0_11, %c0_12] : memref<3x1x16xf32, #tpu.memory_space<vmem>>, vector<1x1x16xf32>
    %12 = vector.shape_cast %11 : vector<1x1x16xf32> to vector<1x16xf32>
    %13 = vector.broadcast %12 : vector<1x16xf32> to vector<16x16xf32>
    %14 = arith.addf %10, %13 : vector<16x16xf32>
    %c2 = arith.constant 2 : index
    %c0_13 = arith.constant 0 : index
    %c0_14 = arith.constant 0 : index
    %15 = vector.load %arg2[%c2, %c0_13, %c0_14] : memref<3x16x16xbf16, #tpu.memory_space<vmem>>, vector<1x16x16xbf16>
    %16 = vector.shape_cast %15 : vector<1x16x16xbf16> to vector<16x16xbf16>
    %cst_15 = arith.constant dense<0.000000e+00> : vector<16x16xf32>
    %17 = tpu.matmul %0, %16, %cst_15 {dimension_numbers = #tpu.dot_dimension_numbers<[1], [0], [0], [1], [0, 0, 1, 1], [], []>} : vector<16x16xbf16>, vector<16x16xbf16>, vector<16x16xf32> -> vector<16x16xf32>
    %c2_16 = arith.constant 2 : index
    %c0_17 = arith.constant 0 : index
    %c0_18 = arith.constant 0 : index
    %18 = vector.load %arg3[%c2_16, %c0_17, %c0_18] : memref<3x1x16xf32, #tpu.memory_space<vmem>>, vector<1x1x16xf32>
    %19 = vector.shape_cast %18 : vector<1x1x16xf32> to vector<1x16xf32>
    %20 = vector.broadcast %19 : vector<1x16xf32> to vector<16x16xf32>
    %21 = arith.addf %17, %20 : vector<16x16xf32>
    %22 = vector.shape_cast %7 : vector<16x16xf32> to vector<2x8x16xf32>
    %23 = arith.truncf %22 : vector<2x8x16xf32> to vector<2x8x16xbf16>
    %24 = vector.shape_cast %14 : vector<16x16xf32> to vector<2x8x16xf32>
    %25 = arith.truncf %24 : vector<2x8x16xf32> to vector<2x8x16xbf16>
    %26 = vector.shape_cast %21 : vector<16x16xf32> to vector<2x8x16xf32>
    %27 = arith.truncf %26 : vector<2x8x16xf32> to vector<2x8x16xbf16>
    "tpu.trace_start"() <{level = 10 : i32, message = "bqh,bkh->bqk"}> : () -> ()
    %cst_19 = arith.constant dense<0.000000e+00> : vector<2x8x8xf32>
    %28 = tpu.matmul %23, %25, %cst_19 {dimension_numbers = #tpu.dot_dimension_numbers<[2], [2], [1], [1], [0, 0, 0, 1, 1, 1], [0], [0]>} : vector<2x8x16xbf16>, vector<2x8x16xbf16>, vector<2x8x8xf32> -> vector<2x8x8xf32>
    "tpu.trace_stop"() : () -> ()
    %cst_20 = arith.constant dense<0xFF800000> : vector<2x8xf32>
    %29 = vector.multi_reduction <maximumf>, %28, %cst_20 [2] : vector<2x8x8xf32> to vector<2x8xf32>
    %30 = vector.shape_cast %29 : vector<2x8xf32> to vector<2x8x1xf32>
    %31 = vector.broadcast %30 : vector<2x8x1xf32> to vector<2x8x8xf32>
    %32 = arith.subf %28, %31 : vector<2x8x8xf32>
    %33 = math.exp %32 : vector<2x8x8xf32>
    %cst_21 = arith.constant dense<0.000000e+00> : vector<2x8xf32>
    %34 = vector.multi_reduction <add>, %33, %cst_21 [2] : vector<2x8x8xf32> to vector<2x8xf32>
    %35 = vector.shape_cast %34 : vector<2x8xf32> to vector<2x8x1xf32>
    %36 = tpu.reciprocal %35 {approx = true} : vector<2x8x1xf32> -> vector<2x8x1xf32>
    %37 = vector.broadcast %36 : vector<2x8x1xf32> to vector<2x8x8xf32>
    %38 = arith.mulf %33, %37 : vector<2x8x8xf32>
    %39 = arith.truncf %38 : vector<2x8x8xf32> to vector<2x8x8xbf16>
    "tpu.trace_start"() <{level = 10 : i32, message = "bqk,bkh->bqh"}> : () -> ()
    %cst_22 = arith.constant dense<0.000000e+00> : vector<2x8x16xf32>
    %40 = tpu.matmul %39, %27, %cst_22 {dimension_numbers = #tpu.dot_dimension_numbers<[2], [1], [1], [2], [0, 0, 0, 1, 1, 2], [0], [0]>} : vector<2x8x8xbf16>, vector<2x8x16xbf16>, vector<2x8x16xf32> -> vector<2x8x16xf32>
    "tpu.trace_stop"() : () -> ()
    %c0_23 = arith.constant 0 : index
    %c0_24 = arith.constant 0 : index
    %c0_25 = arith.constant 0 : index
    %41 = vector.load %arg4[%c0_23, %c0_24, %c0_25] : memref<2x8x16xf32, #tpu.memory_space<vmem>>, vector<2x8x16xf32>
    tpu.vector_store %arg4[%c0_23, %c0_24, %c0_25], %40 {strides = array<i32>} : memref<2x8x16xf32, #tpu.memory_space<vmem>>, vector<2x8x16xf32>,
    return
  }
  func.func @transform_0(%arg0: i32) -> (i32, i32) {
    %c0_i32 = arith.constant 0 : i32
    %c0_i32_0 = arith.constant 0 : i32
    return %arg0, %c0_i32 : i32, i32
  }
  func.func @transform_1(%arg0: i32) -> (i32, i32, i32) {
    %c0_i32 = arith.constant 0 : i32
    %c0_i32_0 = arith.constant 0 : i32
    %c0_i32_1 = arith.constant 0 : i32
    %c0_i32_2 = arith.constant 0 : i32
    return %c0_i32, %c0_i32_0, %c0_i32_1 : i32, i32, i32
  }
  func.func @transform_2(%arg0: i32) -> (i32, i32, i32) {
    %c0_i32 = arith.constant 0 : i32
    %c0_i32_0 = arith.constant 0 : i32
    %c0_i32_1 = arith.constant 0 : i32
    %c0_i32_2 = arith.constant 0 : i32
    return %c0_i32, %c0_i32_0, %c0_i32_1 : i32, i32, i32
  }
  func.func @transform_3(%arg0: i32) -> (i32, i32, i32) {
    %c0_i32 = arith.constant 0 : i32
    %c0_i32_0 = arith.constant 0 : i32
    %c0_i32_1 = arith.constant 0 : i32
    return %arg0, %c0_i32, %c0_i32_0 : i32, i32, i32
  }
}

</mosaic_0001>

<bundles_post_ra>
// kernel: tpu_custom_call.1
= control target key start
LH: loop header
LB: loop body
LE: loop exit
PB: predicated region body
PF: predicated region fallthrough
CT: control target
= control target key end

     0   :  { %8 = vsyncpa [#allocation3], 0  ;;  %s724_s0 = inlined_call_operand.hbm [shape: bf16[16,16], index: 0, kind: input, shape index: {}]   ;;  %s725_s1 = inlined_call_operand.hbm [shape: bf16[3,16,16], index: 1, kind: input, shape index: {}]   ;;  %s726_s2 = inlined_call_operand.vmem [shape: f32[3,1,16], index: 2, kind: input, shape index: {}]   ;;  %s727_s3 = inlined_call_operand.hbm [shape: f32[2,8,16], index: 3, kind: output, shape index: {}]  }
   0x1   :  { %9 = vsyncpa [#allocation6], 0 }
   0x2   :  { %10 = vsyncpa [#allocation4], 0  ;;  %s628_s12 = smov [#allocation2]   ;;  %s556_s16 = scalar_lea.hbm %s724_s0, 128 }
   0x3   :  { %s16_s13 = sshll.u32 %s628_s12, 4  ;;  %p557_p0 = scmp.ne.s32.totalorder %s724_s0, %s556_s16  ;;  %s17_s13 = int_to_ptr.vmem [resolvable:$true] %s16_s13 }
   0x4   :  { %p560_p1 = scmp.lt.u32.totalorder %s556_s16, %s724_s0 }
   0x6   :  { %p562_p2 = pnand %p560_p1, %p557_p0 }
   0x8   :  { %565 = shalt.err (!%p562_p2)
}
   0x9   :  { %s566_s21 = scalar_lea.vmem %s17_s13, 128  ;;  %p571_p4 = scmp.lt.s32.totalorder %s17_s13, %s17_s13 }
   0xa   :  { %p567_p3 = scmp.ne.s32.totalorder %s17_s13, %s566_s21  ;;  %p572_p5 = scmp.lt.s32.totalorder %s566_s21, %s566_s21 }
   0xc   :  { %p573_p6 = por %p572_p5, %p571_p4 }
   0xe   :  { %p574_p7 = pnand %p573_p6, %p567_p3 }
  0x10   :  { %577 = shalt.err (!%p574_p7)
}
  0x11   :  { %s629_s22 = smov 64   ;;  %s630_s23 = smov 4  }
  0x12   :  { %22 = dma.hbm_to_vmem [thread:$0]  %s724_s0, 128, %s17_s13, [#allocation3], %s629_s22, %s629_s22, %s630_s23  }
  0x13   :  { %s631_s26 = smov [#allocation5]   ;;  %s578_s30 = scalar_lea.hbm %s725_s1, 384 }
  0x14   :  { %s28_s27 = sshll.u32 %s631_s26, 4  ;;  %p579_p8 = scmp.ne.s32.totalorder %s725_s1, %s578_s30  ;;  %s29_s27 = int_to_ptr.vmem [resolvable:$true] %s28_s27 }
  0x15   :  { %p582_p9 = scmp.lt.u32.totalorder %s578_s30, %s725_s1 }
  0x17   :  { %p584_p10 = pnand %p582_p9, %p579_p8 }
  0x19   :  { %587 = shalt.err (!%p584_p10)
}
  0x1a   :  { %s588_s8 = scalar_lea.vmem %s29_s27, 384  ;;  %p593_p12 = scmp.lt.s32.totalorder %s29_s27, %s29_s27 }
  0x1b   :  { %p589_p11 = scmp.ne.s32.totalorder %s29_s27, %s588_s8  ;;  %p594_p13 = scmp.lt.s32.totalorder %s588_s8, %s588_s8 }
  0x1d   :  { %p595_p0 = por %p594_p13, %p593_p12 }
  0x1f   :  { %p596_p1 = pnand %p595_p0, %p589_p11 }
  0x21   :  { %599 = shalt.err (!%p596_p1)
}
  0x22   :  { %34 = dma.hbm_to_vmem [thread:$0]  %s725_s1, 384, %s29_s27, [#allocation6], %s629_s22, %s629_s22, %s630_s23  }
  0x23   :  { %622 = dma.done.wait [#allocation3], 128  }
  0x24   :  { %623 = vsyncadd [#allocation3], 4294967168 }
  0x25   :  { %624 = dma.done.wait [#allocation6], 384  }
  0x26   :  { %625 = vsyncadd [#allocation6], 4294966912  ;;  %v632_v0 = vmov 0.0   ;;  %vm633_vm0 = vmmov 0   ;;  %v544_v1 = vld [vmem:[#allocation5 + $0x8] sm:$0xff]   ;;  %v545_v2 = vld [vmem:[#allocation2] sm:$0xff]  }
  0x27   :  { %499 = vmatprep.subr.bf16.mxu1 %v632_v0  ;;  %501 = vmatprep.mubr.msk.bf16.mxu1 %vm633_vm0, %v632_v0  ;;  %vm66_vm1 = vcmask 130048   ;;  %v546_v3 = vld [vmem:[#allocation5] sm:$0xff]   ;;  %v547_v4 = vld [vmem:[#allocation5 + $0x10] sm:$0xff]   ;;  %v468_v5 = vld [vmem:[%s726_s2 + $0x1] ss:$0 sm:$0xff]  ;;  %vm353_vm2 = vcmask 1043456  }
  0x28   :  { %493 = vmatprep.subr.bf16.mxu0 %v632_v0  ;;  %495 = vmatprep.mubr.msk.bf16.mxu0 %vm633_vm0, %v632_v0  ;;  %v463_v10 = vld [vmem:[%s726_s2] ss:$0 sm:$0xff]  ;;  %v472_v22 = vld [vmem:[%s726_s2 + $0x2] ss:$0 sm:$0xff]  ;;  %vm325_vm3 = vcmask 64512   ;;  %s634_s2 = smov [#allocation7]  }
  0x29   :  { %500 = vmatpush3.bf16.msra.mxu1 %v544_v1  ;;  %494 = vmatpush3.bf16.msra.mxu0 %v546_v3  ;;  %s450_s15 = sshll.u32 %s634_s2, 4  ;;  %s451_s15 = int_to_ptr.vmem [resolvable:$true] %s450_s15 }
  0x2a   :  { %511 = vmatprep.subr.bf16.mxu1 %v632_v0  ;;  %505 = vmatprep.subr.bf16.mxu0 %v632_v0  ;;  %s600_s16 = scalar_lea.vmem %s451_s15, 256  ;;  %p605_p3 = scmp.lt.s32.totalorder %s451_s15, %s451_s15 }
  0x2b   :  { %p601_p2 = scmp.ne.s32.totalorder %s451_s15, %s600_s16  ;;  %p606_p4 = scmp.lt.s32.totalorder %s600_s16, %s600_s16 }
  0x2c   :  { %502 = vmatmul.mubr.msk.bf16.vlgmr.msra.gmra.mrb[0].mxu1 %vm66_vm1, %v545_v2  ;;  %496 = vmatmul.mubr.msk.bf16.vlgmr.msra.gmra.mrb[0].mxu0 %vm66_vm1, %v545_v2 }
  0x2d   :  { %513 = vmatprep.mubr.msk.bf16.mxu1 %vm633_vm0, %v632_v0  ;;  %506 = vmatpush3.bf16.msra.mxu0 %v547_v4  ;;  %p607_p5 = por %p606_p4, %p605_p3 }
  0x2e   :  { %507 = vmatprep.mubr.msk.bf16.mxu0 %vm633_vm0, %v632_v0  ;;  %517 = vmatprep.subr.bf16.mxu0 %v632_v0 }
  0x2f   :  { %p608_p6 = pnand %p607_p5, %p601_p2 }
  0x34   :  { %508 = vmatmul.mubr.msk.bf16.vlgmr.msra.gmra.mrb[4].mxu0 %vm66_vm1, %v545_v2 }
  0x35   :  { %519 = vmatprep.mubr.msk.bf16.mxu0 %vm633_vm0, %v632_v0 }
  0xff   :  { %v162_v6 = vpop.f32.mrb[0].mxu1  ;;  %v104_v11 = vpop.f32.mrb[0].mxu0 }
 0x100   :  { %v163_v7 = vadd.f32 %v468_v5, %v162_v6  ;;  %v503_v8 = vpop.f32.mrb[1].mxu1  ;;  %v497_v15 = vpop.f32.mrb[1].mxu0  ;;  %v105_v19 = vadd.f32 %v463_v10, %v104_v11 }
 0x101   :  { %v165_v9 = vpop.f32.mrb[2].mxu1  ;;  %v107_v16 = vpop.f32.mrb[2].mxu0 }
 0x102   :  { %v229_v12 = vpack.c.bf16 %v163_v7, %v163_v7  ;;  %v166_v13 = vadd.f32 %v468_v5, %v165_v9  ;;  %v504_v14 = vpop.f32.mrb[3].mxu1  ;;  %v498_v20 = vpop.f32.mrb[3].mxu0  ;;  %v227_v23 = vpack.c.bf16 %v105_v19, %v105_v19  ;;  %v108_v24 = vadd.f32 %v463_v10, %v107_v16 }
 0x104   :  { %v237_v17 = vsel %vm66_vm1, %v229_v12, 0  ;;  %v230_v18 = vpack.c.bf16 %v166_v13, %v166_v13  ;;  %v228_v29 = vpack.c.bf16 %v108_v24, %v108_v24 }
 0x105   :  { %512 = vmatpush3.bf16.xpose.msra.mxu1 %v237_v17 }
 0x106   :  { %v283_v21 = vsel %vm66_vm1, %v230_v18, 0  ;;  %523 = vmatprep.subr.bf16.mxu1 %v632_v0 }
 0x107   :  { %518 = vmatpush3.bf16.xpose.msra.mxu0 %v283_v21  ;;  %v220_v25 = vpop.f32.mrb[4].mxu0 }
 0x108   :  { %529 = vmatprep.subr.bf16.mxu0 %v632_v0  ;;  %v221_v26 = vadd.f32 %v472_v22, %v220_v25  ;;  %v509_v27 = vpop.f32.mrb[5].mxu0 }
 0x109   :  { %v223_v28 = vpop.f32.mrb[6].mxu0 }
 0x10a   :  { %v231_v30 = vpack.c.bf16 %v221_v26, %v221_v26  ;;  %v224_v31 = vadd.f32 %v472_v22, %v223_v28  ;;  %v510_v32 = vpop.f32.mrb[7].mxu0 }
 0x10c   :  { %514 = vmatmul.mubr.msk.bf16.vlgmr.msra.gmra.mrb[4].mxu1 %vm66_vm1, %v227_v23  ;;  %v355_v33 = vsel %vm353_vm2, %v231_v30, 0  ;;  %v232_v34 = vpack.c.bf16 %v224_v31, %v224_v31 }
 0x10d   :  { %525 = vmatprep.mubr.msk.bf16.mxu1 %vm633_vm0, %v632_v0  ;;  %524 = vmatpush3.bf16.msra.mxu1 %v355_v33 }
 0x10e   :  { %520 = vmatmul.mubr.msk.bf16.vlgmr.msra.gmra.mrb[8].mxu0 %vm66_vm1, %v228_v29  ;;  %v401_v35 = vsel %vm353_vm2, %v232_v34, 0 }
 0x10f   :  { %531 = vmatprep.mubr.msk.bf16.mxu0 %vm633_vm0, %v632_v0  ;;  %530 = vmatpush3.bf16.msra.mxu0 %v401_v35 }
 0x1df   :  { %v273_v36 = vpop.f32.mrb[4].mxu1 }
 0x1e0   :  { %v515_v37 = vpop.f32.mrb[5].mxu1  ;;  %v326_v38 = vsel %vm325_vm3, %v273_v36, -inf }
 0x1e1   :  { %327 = vmax.xlane.f32.xlu0 %v326_v38  ;;  %v276_v39 = vpop.f32.mrb[6].mxu1  ;;  %v319_v40 = vpop.f32.mrb[8].mxu0 }
 0x1e2   :  { %v516_v41 = vpop.f32.mrb[7].mxu1  ;;  %v521_v42 = vpop.f32.mrb[9].mxu0  ;;  %v329_v45 = vsel %vm325_vm3, %v319_v40, -inf }
 0x1e3   :  { %v322_v43 = vpop.f32.mrb[10].mxu0 }
 0x1e4   :  { %v522_v44 = vpop.f32.mrb[11].mxu0 }
 0x1e5   :  { %330 = vmax.xlane.f32.xlu0 %v329_v45 }
 0x26e   :  { %v328_v46 = vpop.xlane.xlu0 %327 }
 0x26f   :  { %v332_v47 = vsub.f32 %v273_v36, %v328_v46 }
 0x271   :  { %v334_v48 = vmul.f32 1.442695, %v332_v47 }
 0x272   :  { %v331_v49 = vpop.xlane.xlu0 %330 }
 0x273   :  { %548 = vpow2.f32 %v334_v48  ;;  %v333_v50 = vsub.f32 %v319_v40, %v331_v49 }
 0x275   :  { %v336_v51 = vmul.f32 1.442695, %v333_v50 }
 0x277   :  { %550 = vpow2.f32 %v336_v51 }
 0x27d   :  { %v549_v52 = vpop.eup %548 }
 0x27e   :  { %v338_v53 = vsel %vm325_vm3, %v549_v52, 0.0 }
 0x27f   :  { %339 = vadd.xlane.f32.xlu1 %v338_v53 }
 0x281   :  { %v551_v54 = vpop.eup %550 }
 0x282   :  { %v341_v55 = vsel %vm325_vm3, %v551_v54, 0.0 }
 0x283   :  { %342 = vadd.xlane.f32.xlu1 %v341_v55 }
 0x30c   :  { %v340_v56 = vpop.xlane.xlu1 %339 }
 0x30d   :  { %552 = vrcp.f32 %v340_v56 }
 0x310   :  { %v343_v57 = vpop.xlane.xlu1 %342 }
 0x311   :  { %554 = vrcp.f32 %v343_v57 }
 0x317   :  { %v553_v58 = vpop.eup %552 }
 0x318   :  { %v346_v59 = vmul.f32 %v553_v58, %v549_v52 }
 0x31a   :  { %v348_v60 = vpack.c.bf16 %v346_v59, %v346_v59 }
 0x31b   :  { %v555_v61 = vpop.eup %554 }
 0x31c   :  { %v347_v62 = vmul.f32 %v555_v61, %v551_v54  ;;  %526 = vmatmul.mubr.msk.bf16.vlgmr.msra.gmra.mrb[8].mxu1 %vm325_vm3, %v348_v60 }
 0x31e   :  { %v349_v63 = vpack.c.bf16 %v347_v62, %v347_v62 }
 0x320   :  { %532 = vmatmul.mubr.msk.bf16.vlgmr.msra.gmra.mrb[12].mxu0 %vm325_vm3, %v349_v63 }
 0x3ef   :  { %v391_v0 = vpop.f32.mrb[8].mxu1 }
 0x3f0   :  { %443 = vst.msk [vmem:[#allocation7] sm:$0xff] %vm66_vm1, %v391_v0  ;;  %v527_v1 = vpop.f32.mrb[9].mxu1 }
 0x3f1   :  { %v394_v2 = vpop.f32.mrb[10].mxu1 }
 0x3f2   :  { %v528_v3 = vpop.f32.mrb[11].mxu1 }
 0x3f3   :  { %v437_v4 = vpop.f32.mrb[12].mxu0 }
 0x3f4   :  { %444 = vst.msk [vmem:[#allocation7 + $0x8] sm:$0xff] %vm66_vm1, %v437_v4  ;;  %v533_v5 = vpop.f32.mrb[13].mxu0 }
 0x3f5   :  { %v440_v6 = vpop.f32.mrb[14].mxu0 }
 0x3f6   :  { %611 = shalt.err (!%p608_p6)
}
 0x3f7   :  { %s612_s19 = scalar_lea.hbm %s727_s3, 256 }
 0x3f8   :  { %p613_p7 = scmp.ne.s32.totalorder %s727_s3, %s612_s19  ;;  %p616_p8 = scmp.lt.u32.totalorder %s612_s19, %s727_s3 }
 0x3fa   :  { %p618_p9 = pnand %p616_p8, %p613_p7 }
 0x3fc   :  { %621 = shalt.err (!%p618_p9)
}
 0x3fd   :  { %s635_s24 = smov 128   ;;  %s636_s25 = smov 8   ;;  %v534_v7 = vpop.f32.mrb[15].mxu0 }
 0x3fe   :  { %456 = dma.vmem_to_hbm [thread:$0]  %s451_s15, 256, %s727_s3, [#allocation4], %s635_s24, %s635_s24, %s636_s25  }
 0x3ff   :  { %626 = dma.done.wait [#allocation4], 256  }
 0x400   :  { %627 = vsyncadd [#allocation4], 4294967040 }
 0x401   :  { %460 = vsyncpa [#allocation3], 1 }
 0x402   :  { %461 = vsyncpa [#allocation6], 1 }
 0x403   :  { %462 = vsyncpa [#allocation4], 1 }

</bundles_post_ra>
